<compile_context>
chip_gen: v6e
topology: v6e:2x2x1
jax: 0.10.0
libtpu: 0.0.40
codegen_flags: <defaults>
</compile_context>

<pallas_src>
import functools

import jax
import jax.numpy as jnp
from jax.experimental import pallas as pl
from jax.experimental.pallas import tpu as pltpu


def _round_up(x: int, m: int) -> int:
    return ((x + m - 1) // m) * m


def _default_vmem_budget() -> int:
    """Per-generation VMEM budget (~75% of physical, headroom for Mosaic)."""
    try:
        cap = int(pltpu.get_tpu_info().vmem_capacity_bytes)
    except Exception:
        cap = 64 * 1024 * 1024          # conservative fallback (v7x-sized)
    return cap * 3 // 4                  # v7x -> 48 MiB, v5e/v6e -> 96 MiB


def _projector_kernel(x_ref, w1_ref, b1_ref, w2_ref, b2_ref, o_ref, acc_ref):
    """One (row-tile i, H-chunk k) grid step.

    x_ref:  (tm, D)    activation row tile, native dtype (cast in-kernel)
    w1_ref: (D, tk)    W1^T chunk, compute dtype (bf16 by default)
    b1_ref: (1, tk)    f32
    w2_ref: (tk, Op)   W2^T chunk, compute dtype
    b2_ref: (1, Op)    f32
    o_ref:  (tm, Op)   output tile (written on last H chunk)
    acc_ref:(tm, Op)   f32 accumulator scratch
    """
    k = pl.program_id(1)

    @pl.when(k == 0)
    def _init():
        acc_ref[...] = jnp.zeros_like(acc_ref)

    # Cast the activation tile to the matmul compute dtype on the VPU
    # (hidden under the MXU); accumulate both matmuls in f32 on the MXU.
    x = x_ref[...].astype(w1_ref.dtype)
    h = jnp.dot(x, w1_ref[...], preferred_element_type=jnp.float32)
    h = jnp.maximum(h + b1_ref[...], 0.0)                 # bias + ReLU in f32
    acc_ref[...] += jnp.dot(h.astype(w2_ref.dtype), w2_ref[...],
                            preferred_element_type=jnp.float32)

    @pl.when(k == pl.num_programs(1) - 1)
    def _finalize():
        o_ref[...] = (acc_ref[...] + b2_ref[...]).astype(o_ref.dtype)


def prepare_projector_params(w1, b1, w2, b2, *, compute_dtype=jnp.bfloat16):
    """One-time parameter prep (hoisted out of the forward path).

    w1: (H, D), b1: (H,), w2: (O, H), b2: (O,) -- PyTorch nn.Linear layout.
    Returns (params_dict_of_arrays, (D, H, O) as static Python ints).
    Weights are transposed and zero-padded to lane-dense H/O (multiples of
    128) in the compute dtype; biases stay f32.
    """
    H, D = w1.shape
    O, H2 = w2.shape
    assert H2 == H, "w2 hidden dim must match w1 output dim"
    Hp, Op = _round_up(H, 128), _round_up(O, 128)

    w1_t = jnp.zeros((D, Hp), compute_dtype).at[:, :H].set(
        w1.T.astype(compute_dtype))
    b1_p = jnp.zeros((1, Hp), jnp.float32).at[0, :H].set(b1.astype(jnp.float32))
    w2_t = jnp.zeros((Hp, Op), compute_dtype).at[:H, :O].set(
        w2.T.astype(compute_dtype))
    b2_p = jnp.zeros((1, Op), jnp.float32).at[0, :O].set(b2.astype(jnp.float32))

    params = {"w1_t": w1_t, "b1": b1_p, "w2_t": w2_t, "b2": b2_p}
    dims = (int(D), int(H), int(O))   # static ints: bake with functools.partial
    return params, dims


def projector_forward(x, params, *, dims, tm=256, tk=None,
                      vmem_budget_bytes=None):
    """x: (b, t, d) in its native dtype.  params/dims from prepare_projector_params.
    `dims` must be static Python ints (bake via functools.partial before jit).
    Returns (b, t, O) in x.dtype."""
    D, H, O = dims
    b, t, d = x.shape
    assert d == D, f"input feature dim {d} != projector input_dim {D}"

    w1_t, b1_p = params["w1_t"], params["b1"]
    w2_t, b2_p = params["w2_t"], params["b2"]
    Hp = w1_t.shape[1]
    Op = w2_t.shape[1]
    cdtype = w1_t.dtype
    citem = jnp.dtype(cdtype).itemsize
    xitem = jnp.dtype(x.dtype).itemsize
    oitem = xitem
    M = b * t

    if vmem_budget_bytes is None:
        vmem_budget_bytes = _default_vmem_budget()

    # --- row tile: big, MXU-friendly, and >= 2 tiles when M allows (v7x 2 TCs)
    tm_eff = min(tm, _round_up(M, 8))
    if M >= 2 * 128:
        tm_eff = min(tm_eff, max(128, _round_up(pl.cdiv(M, 2), 128)))

    # --- VMEM model: double-buffered x/out tiles + double-buffered weight
    #     chunks + f32 h intermediate (+ its compute-dtype copy) + accumulator.
    def vmem_need(tm_, tk_):
        weights = 2 * ((D * tk_ + tk_ * Op) * citem + (tk_ + Op) * 4)
        xtile = 2 * tm_ * D * xitem
        otile = 2 * tm_ * Op * oitem
        h_tmp = tm_ * tk_ * (4 + citem)
        acc = tm_ * Op * 4
        return weights + xtile + otile + h_tmp + acc

    # --- H chunk: largest multiple of 128 dividing Hp that fits the budget.
    n128 = Hp // 128
    if tk is not None:
        assert tk % 128 == 0 and Hp % tk == 0, \
            "tk must be a multiple of 128 dividing the padded hidden dim"
        tk_eff = tk
    else:
        tk_eff = 128
        for nk in range(1, n128 + 1):
            if n128 % nk == 0 and vmem_need(tm_eff, Hp // nk) <= vmem_budget_bytes:
                tk_eff = Hp // nk
                break

    # --- if still over budget, shrink the row tile in MXU-friendly steps.
    while tm_eff > 128 and vmem_need(tm_eff, tk_eff) > vmem_budget_bytes:
        tm_eff = max(128, _round_up(tm_eff // 2, 128))

    grid_m = pl.cdiv(M, tm_eff)
    grid_h = Hp // tk_eff

    # No wrapper-side pad or cast: reshape is a view; partial last row block
    # and the dtype cast are handled inside the kernel / by the grid.
    x2 = x.reshape(M, D)

    flops = 2 * M * (D * Hp + Hp * Op)
    bytes_accessed = (M * D * xitem + (D * Hp + Hp * Op) * citem
                      + (Hp + Op) * 4 + M * Op * oitem)

    out = pl.pallas_call(
        _projector_kernel,
        out_shape=jax.ShapeDtypeStruct((M, Op), x.dtype),
        grid_spec=pltpu.PrefetchScalarGridSpec(
            num_scalar_prefetch=0,
            grid=(grid_m, grid_h),
            in_specs=[
                pl.BlockSpec((tm_eff, D), lambda i, k: (i, 0)),    # x row tile
                pl.BlockSpec((D, tk_eff), lambda i, k: (0, k)),    # W1^T chunk
                pl.BlockSpec((1, tk_eff), lambda i, k: (0, k)),    # b1 chunk
                pl.BlockSpec((tk_eff, Op), lambda i, k: (k, 0)),   # W2^T chunk
                pl.BlockSpec((1, Op), lambda i, k: (0, 0)),        # b2
            ],
            out_specs=pl.BlockSpec((tm_eff, Op), lambda i, k: (i, 0)),
            scratch_shapes=[pltpu.VMEM((tm_eff, Op), jnp.float32)],
        ),
        compiler_params=pltpu.CompilerParams(
            dimension_semantics=("parallel", "arbitrary"),
            vmem_limit_bytes=int(vmem_budget_bytes),
        ),
        cost_estimate=pl.CostEstimate(
            flops=flops, transcendentals=0, bytes_accessed=bytes_accessed),
    )(x2, w1_t, b1_p, w2_t, b2_p)

    y = out if Op == O else out[:, :O]
    return y.reshape(b, t, O)


def projector_reference(x, w1, b1, w2, b2, *, compute_dtype=jnp.float32):
    """Pure-JAX reference that mimics the kernel's dtype strategy."""
    b, t, d = x.shape
    x2 = x.reshape(b * t, d).astype(compute_dtype)
    h = jnp.dot(x2, w1.T.astype(compute_dtype),
                preferred_element_type=jnp.float32)
    h = jnp.maximum(h + b1.astype(jnp.float32), 0.0)
    y = jnp.dot(h.astype(compute_dtype), w2.T.astype(compute_dtype),
                preferred_element_type=jnp.float32)
    y = y + b2.astype(jnp.float32)
    return y.reshape(b, t, -1).astype(x.dtype)


if __name__ == "__main__":
    jax.config.update("jax_default_matmul_precision", "highest")

    key = jax.random.PRNGKey(0)
    kx, kw1, kb1, kw2, kb2, kx2, kw3, kb3, kw4, kb4 = jax.random.split(key, 10)

    # ---- Test 1: f32 compute path, small ragged dims (module-sized) --------
    batch, seq = 2, 8
    input_dim, hidden_dim, output_dim = 32, 64, 48

    x = jax.random.normal(kx, (batch, seq, input_dim), dtype=jnp.float32)
    # PyTorch nn.Linear parameter layout: (out, in) / (out,)
    w1 = jax.random.normal(kw1, (hidden_dim, input_dim), jnp.float32) * 0.05
    b1 = jax.random.normal(kb1, (hidden_dim,), jnp.float32) * 0.05
    w2 = jax.random.normal(kw2, (output_dim, hidden_dim), jnp.float32) * 0.05
    b2 = jax.random.normal(kb2, (output_dim,), jnp.float32) * 0.05

    params, dims = prepare_projector_params(w1, b1, w2, b2,
                                            compute_dtype=jnp.float32)
    fwd = jax.jit(functools.partial(projector_forward, dims=dims))
    y = jax.block_until_ready(fwd(x, params))
    y_ref = projector_reference(x, w1, b1, w2, b2, compute_dtype=jnp.float32)
    assert y.shape == (batch, seq, output_dim)
    assert jnp.allclose(y, y_ref, atol=1e-4, rtol=1e-4), "f32 path mismatch"

    # ---- Test 2: default bf16 compute + H-chunked accumulation (grid_h=2) --
    in2, hid2, out2 = 128, 256, 128
    x_b = jax.random.normal(kx2, (batch, seq, in2), jnp.float32)
    w3 = jax.random.normal(kw3, (hid2, in2), jnp.float32) * 0.05
    b3 = jax.random.normal(kb3, (hid2,), jnp.float32) * 0.05
    w4 = jax.random.normal(kw4, (out2, hid2), jnp.float32) * 0.05
    b4 = jax.random.normal(kb4, (out2,), jnp.float32) * 0.05

    params2, dims2 = prepare_projector_params(w3, b3, w4, b4)   # bf16 default
    fwd2 = jax.jit(functools.partial(projector_forward, dims=dims2, tk=128))
    y2 = jax.block_until_ready(fwd2(x_b, params2))
    y2_ref = projector_reference(x_b, w3, b3, w4, b4,
                                 compute_dtype=jnp.bfloat16)
    assert y2.shape == (batch, seq, out2)
    assert jnp.allclose(y2, y2_ref, atol=1e-2, rtol=1e-2), "bf16 path mismatch"

    print("KERNEL_OK")
</pallas_src>

<mosaic_0001>
module attributes {stable_mosaic.version = 11 : i64} {
  func.func @_projector_kernel(%arg0: i32, %arg1: i32, %arg2: memref<16x32xf32, #tpu.memory_space<vmem>>, %arg3: memref<32x128xf32, #tpu.memory_space<vmem>>, %arg4: memref<1x128xf32, #tpu.memory_space<vmem>>, %arg5: memref<128x128xf32, #tpu.memory_space<vmem>>, %arg6: memref<1x128xf32, #tpu.memory_space<vmem>>, %arg7: memref<16x128xf32, #tpu.memory_space<vmem>>, %arg8: memref<16x128xf32, #tpu.memory_space<vmem>>) attributes {dimension_semantics = [#tpu.dimension_semantics<parallel>, #tpu.dimension_semantics<arbitrary>], iteration_bounds = array<i64: 1, 1>, scalar_prefetch = 0 : i64, scratch_operands = 1 : i64, tpu.core_type = #tpu.core_type<tc>, window_params = [{transform_indices = @transform_0, window_bounds = array<i64: 16, 32>}, {transform_indices = @transform_1, window_bounds = array<i64: 32, 128>}, {transform_indices = @transform_2, window_bounds = array<i64: 1, 128>}, {transform_indices = @transform_3, window_bounds = array<i64: 128, 128>}, {pipeline_mode = #tpu.pipeline_mode<synchronous>, transform_indices = @transform_4, window_bounds = array<i64: 1, 128>}, {transform_indices = @transform_5, window_bounds = array<i64: 16, 128>}]} {
    %c0_i32 = arith.constant 0 : i32
    %0 = arith.cmpi eq, %arg1, %c0_i32 : i32
    %1 = arith.extui %0 : i1 to i32
    %c0_i32_0 = arith.constant 0 : i32
    %2 = arith.cmpi ne, %1, %c0_i32_0 : i32
    scf.if %2 {
      %cst_16 = arith.constant 0.000000e+00 : f32
      %19 = vector.broadcast %cst_16 : f32 to vector<16x128xf32>
      %c0_17 = arith.constant 0 : index
      %c0_18 = arith.constant 0 : index
      %20 = vector.load %arg8[%c0_17, %c0_18] : memref<16x128xf32, #tpu.memory_space<vmem>>, vector<16x128xf32>
      tpu.vector_store %arg8[%c0_17, %c0_18], %19 {strides = array<i32>} : memref<16x128xf32, #tpu.memory_space<vmem>>, vector<16x128xf32>,
    } else {
    }
    %c0 = arith.constant 0 : index
    %c0_1 = arith.constant 0 : index
    %3 = vector.load %arg2[%c0, %c0_1] : memref<16x32xf32, #tpu.memory_space<vmem>>, vector<16x32xf32>
    %c0_2 = arith.constant 0 : index
    %c0_3 = arith.constant 0 : index
    %4 = vector.load %arg3[%c0_2, %c0_3] : memref<32x128xf32, #tpu.memory_space<vmem>>, vector<32x128xf32>
    %cst = arith.constant dense<0.000000e+00> : vector<16x128xf32>
    %5 = tpu.matmul %3, %4, %cst {dimension_numbers = #tpu.dot_dimension_numbers<[1], [0], [0], [1], [0, 0, 1, 1], [], []>, precision = #tpu.contract_precision<fp32>} : vector<16x32xf32>, vector<32x128xf32>, vector<16x128xf32> -> vector<16x128xf32>
    %c0_4 = arith.constant 0 : index
    %c0_5 = arith.constant 0 : index
    %6 = vector.load %arg4[%c0_4, %c0_5] : memref<1x128xf32, #tpu.memory_space<vmem>>, vector<1x128xf32>
    %7 = vector.broadcast %6 : vector<1x128xf32> to vector<16x128xf32>
    %8 = arith.addf %5, %7 : vector<16x128xf32>
    %cst_6 = arith.constant 0.000000e+00 : f32
    %9 = vector.broadcast %cst_6 : f32 to vector<16x128xf32>
    %10 = arith.maximumf %8, %9 : vector<16x128xf32>
    %c0_7 = arith.constant 0 : index
    %c0_8 = arith.constant 0 : index
    %11 = vector.load %arg8[%c0_7, %c0_8] : memref<16x128xf32, #tpu.memory_space<vmem>>, vector<16x128xf32>
    %c0_9 = arith.constant 0 : index
    %c0_10 = arith.constant 0 : index
    %12 = vector.load %arg5[%c0_9, %c0_10] : memref<128x128xf32, #tpu.memory_space<vmem>>, vector<128x128xf32>
    %cst_11 = arith.constant dense<0.000000e+00> : vector<16x128xf32>
    %13 = tpu.matmul %10, %12, %cst_11 {dimension_numbers = #tpu.dot_dimension_numbers<[1], [0], [0], [1], [0, 0, 1, 1], [], []>, precision = #tpu.contract_precision<fp32>} : vector<16x128xf32>, vector<128x128xf32>, vector<16x128xf32> -> vector<16x128xf32>
    %14 = arith.addf %11, %13 : vector<16x128xf32>
    %c0_12 = arith.constant 0 : index
    %c0_13 = arith.constant 0 : index
    %15 = vector.load %arg8[%c0_12, %c0_13] : memref<16x128xf32, #tpu.memory_space<vmem>>, vector<16x128xf32>
    tpu.vector_store %arg8[%c0_12, %c0_13], %14 {strides = array<i32>} : memref<16x128xf32, #tpu.memory_space<vmem>>, vector<16x128xf32>,
    %c0_i32_14 = arith.constant 0 : i32
    %16 = arith.cmpi eq, %arg1, %c0_i32_14 : i32
    %17 = arith.extui %16 : i1 to i32
    %c0_i32_15 = arith.constant 0 : i32
    %18 = arith.cmpi ne, %17, %c0_i32_15 : i32
    scf.if %18 {
      %c0_16 = arith.constant 0 : index
      %c0_17 = arith.constant 0 : index
      %19 = vector.load %arg8[%c0_16, %c0_17] : memref<16x128xf32, #tpu.memory_space<vmem>>, vector<16x128xf32>
      %c0_18 = arith.constant 0 : index
      %c0_19 = arith.constant 0 : index
      %20 = vector.load %arg6[%c0_18, %c0_19] : memref<1x128xf32, #tpu.memory_space<vmem>>, vector<1x128xf32>
      %21 = vector.broadcast %20 : vector<1x128xf32> to vector<16x128xf32>
      %22 = arith.addf %19, %21 : vector<16x128xf32>
      %c0_20 = arith.constant 0 : index
      %c0_21 = arith.constant 0 : index
      %23 = vector.load %arg7[%c0_20, %c0_21] : memref<16x128xf32, #tpu.memory_space<vmem>>, vector<16x128xf32>
      tpu.vector_store %arg7[%c0_20, %c0_21], %22 {strides = array<i32>} : memref<16x128xf32, #tpu.memory_space<vmem>>, vector<16x128xf32>,
    } else {
    }
    return
  }
  func.func @transform_0(%arg0: i32, %arg1: i32) -> (i32, i32) {
    %c0_i32 = arith.constant 0 : i32
    %c0_i32_0 = arith.constant 0 : i32
    return %arg0, %c0_i32 : i32, i32
  }
  func.func @transform_1(%arg0: i32, %arg1: i32) -> (i32, i32) {
    %c0_i32 = arith.constant 0 : i32
    %c0_i32_0 = arith.constant 0 : i32
    return %c0_i32, %arg1 : i32, i32
  }
  func.func @transform_2(%arg0: i32, %arg1: i32) -> (i32, i32) {
    %c0_i32 = arith.constant 0 : i32
    %c0_i32_0 = arith.constant 0 : i32
    return %c0_i32, %arg1 : i32, i32
  }
  func.func @transform_3(%arg0: i32, %arg1: i32) -> (i32, i32) {
    %c0_i32 = arith.constant 0 : i32
    %c0_i32_0 = arith.constant 0 : i32
    return %arg1, %c0_i32 : i32, i32
  }
  func.func @transform_4(%arg0: i32, %arg1: i32) -> (i32, i32) {
    %c0_i32 = arith.constant 0 : i32
    %c0_i32_0 = arith.constant 0 : i32
    %c0_i32_1 = arith.constant 0 : i32
    return %c0_i32, %c0_i32_0 : i32, i32
  }
  func.func @transform_5(%arg0: i32, %arg1: i32) -> (i32, i32) {
    %c0_i32 = arith.constant 0 : i32
    %c0_i32_0 = arith.constant 0 : i32
    return %arg0, %c0_i32 : i32, i32
  }
}

</mosaic_0001>

<bundles_post_ra>
// kernel: projector_forward.1
= control target key start
LH: loop header
LB: loop body
LE: loop exit
PB: predicated region body
PF: predicated region fallthrough
CT: control target
= control target key end

     0   :  { %10 = vsyncpa [#allocation4], 0  ;;  %s2296_s0 = inlined_call_operand.hbm [shape: f32[16,32], index: 0, kind: input, shape index: {}]   ;;  %s2297_s1 = inlined_call_operand.hbm [shape: f32[32,128], index: 1, kind: input, shape index: {}]   ;;  %s2298_s2 = inlined_call_operand.vmem [shape: f32[1,128], index: 2, kind: input, shape index: {}]   ;;  %s2299_s3 = inlined_call_operand.hbm [shape: f32[128,128], index: 3, kind: input, shape index: {}]   ;;  %s2300_s4 = inlined_call_operand.vmem [shape: f32[1,128], index: 4, kind: input, shape index: {}]   ;;  %s2301_s5 = inlined_call_operand.vmem [shape: f32[16,128], index: 5, kind: output, shape index: {}]  }
   0x1   :  { %11 = vsyncpa [#allocation6], 0  ;;  %s1836_s18 = smov [#allocation5]   ;;  %s1837_s20 = smov [#allocation3]  }
   0x2   :  { %s29_s19 = sshll.u32 %s1836_s18, 4  ;;  %s17_s21 = sshll.u32 %s1837_s20, 4  ;;  %s30_s19 = int_to_ptr.vmem [resolvable:$true] %s29_s19  ;;  %s18_s21 = int_to_ptr.vmem [resolvable:$true] %s17_s21 }
   0x3   :  { %s1780_s22 = scalar_lea.vmem %s30_s19, 512  ;;  %p1785_p1 = scmp.lt.s32.totalorder %s30_s19, %s30_s19 }
   0x4   :  { %p1781_p0 = scmp.ne.s32.totalorder %s30_s19, %s1780_s22  ;;  %p1786_p2 = scmp.lt.s32.totalorder %s1780_s22, %s1780_s22 }
   0x6   :  { %p1787_p3 = por %p1786_p2, %p1785_p1 }
   0x8   :  { %p1788_p4 = pnand %p1787_p3, %p1781_p0 }
   0xa   :  { %1791 = shalt.err (!%p1788_p4)
}
   0xb   :  { %s1838_s23 = smov 128   ;;  %s1839_s24 = smov 8  }
   0xc   :  { %35 = dma.hbm_to_vmem [thread:$0]  %s2297_s1, 512, %s30_s19, [#allocation6], %s1838_s23, %s1838_s23, %s1839_s24  }
   0xd   :  { %s1800_s27 = scalar_lea.vmem %s18_s21, 256  ;;  %p1805_p6 = scmp.lt.s32.totalorder %s18_s21, %s18_s21 }
   0xe   :  { %p1801_p5 = scmp.ne.s32.totalorder %s18_s21, %s1800_s27  ;;  %p1806_p7 = scmp.lt.s32.totalorder %s1800_s27, %s1800_s27 }
  0x10   :  { %p1807_p8 = por %p1806_p7, %p1805_p6 }
  0x12   :  { %p1808_p9 = pnand %p1807_p8, %p1801_p5 }
  0x14   :  { %1811 = shalt.err (!%p1808_p9)
}
  0x15   :  { %23 = dma.hbm_to_vmem [thread:$0]  %s2296_s0, 256, %s18_s21, [#allocation4], %s1838_s23, %s1838_s23, %s1839_s24  }
  0x16   :  { %s1840_s30 = smov [#allocation7]  }
  0x17   :  { %s43_s6 = sshll.u32 %s1840_s30, 4  ;;  %s44_s6 = int_to_ptr.vmem [resolvable:$true] %s43_s6 }
  0x18   :  { %s1820_s7 = scalar_lea.vmem %s44_s6, 2048  ;;  %p1825_p11 = scmp.lt.s32.totalorder %s44_s6, %s44_s6 }
  0x19   :  { %p1821_p10 = scmp.ne.s32.totalorder %s44_s6, %s1820_s7  ;;  %p1826_p12 = scmp.lt.s32.totalorder %s1820_s7, %s1820_s7 }
  0x1b   :  { %p1827_p13 = por %p1826_p12, %p1825_p11 }
  0x1d   :  { %p1828_p0 = pnand %p1827_p13, %p1821_p10 }
  0x1f   :  { %1831 = shalt.err (!%p1828_p0)
}
  0x20   :  { %49 = dma.hbm_to_vmem [thread:$0]  %s2299_s3, 2048, %s44_s6, [#allocation6], %s1838_s23, %s1838_s23, %s1839_s24  }
  0x21   :  { %1832 = dma.done.wait [#allocation4], 256  }
  0x22   :  { %1833 = vsyncadd [#allocation4], 4294967040 }
  0x23   :  { %1834 = dma.done.wait [#allocation6], 2560  }
  0x24   :  { %1835 = vsyncadd [#allocation6], 4294964736  ;;  %vm80_vm0 = vcmask 261120   ;;  %v72_v0 = vld [vmem:[#allocation5 + $0x18] sm:$0xff]  ;;  %v71_v1 = vld [vmem:[#allocation5 + $0x10] sm:$0xff] }
  0x25   :  { %v70_v2 = vld [vmem:[#allocation5 + $0x8] sm:$0xff]  ;;  %v1880_v3 = vand.u32 4294901760, %v72_v0  ;;  %v1882_v4 = vand.u32 4294901760, %v71_v1  ;;  %v69_v6 = vld [vmem:[#allocation5] sm:$0xff]  ;;  %v67_v7 = vld [vmem:[#allocation3] sm:$0xff] }
  0x26   :  { %v1884_v5 = vand.u32 4294901760, %v70_v2  ;;  %v68_v8 = vld [vmem:[#allocation3 + $0x8] sm:$0xff]  ;;  %v1886_v9 = vand.u32 4294901760, %v69_v6  ;;  %v82_v10 = vsel %vm80_vm0, %v67_v7, 0  ;;  %v633_v39 = vld [vmem:[#allocation7 + $0x70] sm:$0xff]  ;;  %v632_v50 = vld [vmem:[#allocation7 + $0x68] sm:$0xff] }
  0x27   :  { %v85_v11 = vsel %vm80_vm0, %v68_v8, 0  ;;  %1491 = vmatprep.subr.mxu0 %v1880_v3  ;;  %v202_v12 = vsub.f32 %v72_v0, %v1880_v3  ;;  %v1890_v13 = vand.u32 4294901760, %v82_v10  ;;  %v209_v15 = vsub.f32 %v71_v1, %v1882_v4  ;;  %v634_v38 = vld [vmem:[#allocation7 + $0x78] sm:$0xff]  ;;  %v631_v52 = vld [vmem:[#allocation7 + $0x60] sm:$0xff]  ;;  %v629_v59 = vld [vmem:[#allocation7 + $0x50] sm:$0xff] }
  0x28   :  { %v1892_v14 = vand.u32 4294901760, %v85_v11  ;;  %1492 = vmatpush3.msra.mxu0 %v1880_v3  ;;  %v216_v16 = vsub.f32 %v70_v2, %v1884_v5  ;;  %v223_v17 = vsub.f32 %v69_v6, %v1886_v9  ;;  %v1919_v40 = vand.u32 4294901760, %v634_v38  ;;  %v630_v55 = vld [vmem:[#allocation7 + $0x58] sm:$0xff]  ;;  %v628_v0 = vld [vmem:[#allocation7 + $0x48] sm:$0xff]  ;;  %v627_v6 = vld [vmem:[#allocation7 + $0x40] sm:$0xff] }
  0x29   :  { %1493 = vmatprep.subr.mxu0 %v1882_v4  ;;  %v203_v18 = vand.u32 4294901760, %v202_v12  ;;  %v1900_v19 = vsub.f32 %v82_v10, %v1890_v13  ;;  %v210_v20 = vand.u32 4294901760, %v209_v15  ;;  %1510 = vmatprep.mubr.f32.mxu1 %v1890_v13  ;;  %v1923_v41 = vand.u32 4294901760, %v633_v39 }
  0x2a   :  { %v1903_v21 = vsub.f32 %v85_v11, %v1892_v14  ;;  %1494 = vmatpush3.msra.mxu0 %v1882_v4  ;;  %v217_v22 = vand.u32 4294901760, %v216_v16  ;;  %v1907_v23 = vand.u32 4294901760, %v223_v17  ;;  %v1929_v42 = vsub.f32 %v634_v38, %v1919_v40 }
  0x2b   :  { %1495 = vmatprep.subr.mxu0 %v1884_v5  ;;  %v204_v24 = vsub.f32 %v202_v12, %v203_v18  ;;  %v158_v25 = vand.u32 4294901760, %v1900_v19  ;;  %v211_v26 = vsub.f32 %v209_v15, %v210_v20  ;;  %v1934_v43 = vsub.f32 %v633_v39, %v1923_v41 }
  0x2c   :  { %v168_v27 = vand.u32 4294901760, %v1903_v21  ;;  %1496 = vmatpush3.msra.mxu0 %v1884_v5  ;;  %v218_v28 = vsub.f32 %v216_v16, %v217_v22  ;;  %v225_v29 = vsub.f32 %v223_v17, %v1907_v23  ;;  %v1939_v44 = vand.u32 4294901760, %v1929_v42 }
  0x2d   :  { %1497 = vmatprep.subr.mxu0 %v1886_v9  ;;  %v205_v30 = vand.u32 4294901760, %v204_v24  ;;  %v159_v31 = vsub.f32 %v1900_v19, %v158_v25  ;;  %v212_v32 = vand.u32 4294901760, %v211_v26  ;;  %v1943_v45 = vand.u32 4294901760, %v1934_v43  ;;  %v624_v24 = vld [vmem:[#allocation7 + $0x28] sm:$0xff] }
  0x2e   :  { %v169_v33 = vsub.f32 %v1903_v21, %v168_v27  ;;  %1498 = vmatpush3.msra.mxu0 %v1886_v9  ;;  %v219_v36 = vand.u32 4294901760, %v218_v28  ;;  %v226_v37 = vand.u32 4294901760, %v225_v29  ;;  %v740_v46 = vsub.f32 %v1929_v42, %v1939_v44 }
  0x2f   :  { %1502 = vmatprep.subr.mxu1 %v205_v30  ;;  %v160_v34 = vand.u32 4294901760, %v159_v31  ;;  %1513 = vmatprep.subr.mxu0 %v202_v12  ;;  %v747_v47 = vsub.f32 %v1934_v43, %v1943_v45  ;;  %v1967_v51 = vand.u32 4294901760, %v632_v50  ;;  %v1972_v54 = vand.u32 4294901760, %v631_v52 }
  0x30   :  { %v170_v35 = vand.u32 4294901760, %v169_v33  ;;  %1503 = vmatpush3.msra.mxu1 %v205_v30  ;;  %v741_v48 = vand.u32 4294901760, %v740_v46  ;;  %v1982_v58 = vand.u32 4294901760, %v630_v55  ;;  %v1994_v63 = vand.u32 4294901760, %v629_v59  ;;  %v623_v30 = vld [vmem:[#allocation7 + $0x20] sm:$0xff] }
  0x31   :  { %1499 = vmatprep.mubr.f32.mxu0 %v160_v34  ;;  %1504 = vmatprep.subr.mxu1 %v212_v32  ;;  %v748_v49 = vand.u32 4294901760, %v747_v47  ;;  %v1970_v53 = vsub.f32 %v632_v50, %v1967_v51  ;;  %v1980_v57 = vsub.f32 %v631_v52, %v1972_v54  ;;  %v2015_v10 = vand.u32 4294901760, %v627_v6 }
  0x32   :  { %1500 = vmatmul.mubr.f32.vlgmr.msra.gmra.mxu0 %v170_v35  ;;  %1505 = vmatpush3.msra.mxu1 %v212_v32  ;;  %v1992_v62 = vsub.f32 %v630_v55, %v1982_v58  ;;  %v2053_v28 = vand.u32 4294901760, %v624_v24  ;;  %v2066_v35 = vand.u32 4294901760, %v623_v30 }
  0x33   :  { %1514 = vmatpush3.msra.mxu0 %v202_v12  ;;  %1506 = vmatprep.subr.mxu1 %v219_v36  ;;  %v1977_v56 = vand.u32 4294901760, %v1970_v53  ;;  %v1989_v61 = vand.u32 4294901760, %v1980_v57  ;;  %v626_v12 = vld [vmem:[#allocation7 + $0x38] sm:$0xff] }
  0x34   :  { %1515 = vmatprep.subr.mxu0 %v209_v15  ;;  %1507 = vmatpush3.msra.mxu1 %v219_v36  ;;  %v2063_v34 = vsub.f32 %v624_v24, %v2053_v28  ;;  %v622_v36 = vld [vmem:[#allocation7 + $0x18] sm:$0xff]  ;;  %v2078_v47 = vsub.f32 %v623_v30, %v2066_v35 }
  0x35   :  { %1516 = vmatpush3.msra.mxu0 %v209_v15  ;;  %1508 = vmatprep.subr.mxu1 %v226_v37  ;;  %v754_v60 = vsub.f32 %v1970_v53, %v1977_v56  ;;  %v761_v2 = vsub.f32 %v1980_v57, %v1989_v61  ;;  %v2024_v15 = vsub.f32 %v627_v6, %v2015_v10  ;;  %v2074_v46 = vand.u32 4294901760, %v622_v36 }
  0x36   :  { %1517 = vmatprep.subr.mxu0 %v216_v16  ;;  %1509 = vmatpush3.msra.mxu1 %v226_v37  ;;  %v2072_v39 = vand.u32 4294901760, %v2063_v34 }
  0x37   :  { %1518 = vmatpush3.msra.mxu0 %v216_v16  ;;  %1511 = vmatmul.mubr.f32.vlgmr.msra.gmra.mxu1 %v1892_v14  ;;  %v755_v1 = vand.u32 4294901760, %v754_v60  ;;  %v762_v7 = vand.u32 4294901760, %v761_v2  ;;  %v2026_v16 = vand.u32 4294901760, %v626_v12  ;;  %v2084_v52 = vsub.f32 %v622_v36, %v2074_v46  ;;  %v620_v60 = vld [vmem:[#allocation7 + $0x8] sm:$0xff] }
  0x38   :  { %1519 = vmatprep.subr.mxu0 %v223_v17  ;;  %1524 = vmatprep.subr.mxu1 %v1880_v3  ;;  %2320 = vst [vmem:[#allocation12_spill] sm:$0xff] %v2072_v39  ;;  %v810_v50 = vsub.f32 %v2063_v34, %v2072_v39  ;;  %v2099_v6 = vand.u32 4294901760, %v620_v60 }
  0x39   :  { %1520 = vmatpush3.msra.mxu0 %v223_v17  ;;  %1521 = vmatprep.mubr.f32.mxu0 %v1900_v19 }
  0x3a   :  { %1525 = vmatpush3.msra.mxu1 %v1880_v3  ;;  %1522 = vmatmul.mubr.f32.vlgmr.msra.gmra.mxu0 %v1903_v21  ;;  %v2037_v21 = vsub.f32 %v626_v12, %v2026_v16 }
  0x3b   :  { %1526 = vmatprep.subr.mxu1 %v1882_v4  ;;  %1535 = vmatprep.subr.mxu0 %v203_v18 }
  0x3c   :  { %1527 = vmatpush3.msra.mxu1 %v1882_v4  ;;  %1536 = vmatpush3.msra.mxu0 %v203_v18  ;;  %v625_v18 = vld [vmem:[#allocation7 + $0x30] sm:$0xff]  ;;  %v2048_v26 = vand.u32 4294901760, %v2037_v21 }
  0x3d   :  { %1528 = vmatprep.subr.mxu1 %v1884_v5  ;;  %1537 = vmatprep.subr.mxu0 %v210_v20 }
  0x3e   :  { %1529 = vmatpush3.msra.mxu1 %v1884_v5  ;;  %1538 = vmatpush3.msra.mxu0 %v210_v20  ;;  %v2034_v20 = vand.u32 4294901760, %v2024_v15  ;;  %2318 = vst [vmem:[#allocation10_spill] sm:$0xff] %v2048_v26  ;;  %v796_v32 = vsub.f32 %v2037_v21, %v2048_v26 }
  0x3f   :  { %1530 = vmatprep.subr.mxu1 %v1886_v9  ;;  %1539 = vmatprep.subr.mxu0 %v217_v22 }
  0x40   :  { %1531 = vmatpush3.msra.mxu1 %v1886_v9  ;;  %1532 = vmatprep.mubr.f32.mxu1 %v158_v25  ;;  %v789_v25 = vsub.f32 %v2024_v15, %v2034_v20  ;;  %v797_v37 = vand.u32 4294901760, %v796_v32 }
  0x41   :  { %1540 = vmatpush3.msra.mxu0 %v217_v22  ;;  %1533 = vmatmul.mubr.f32.vlgmr.msra.gmra.mxu1 %v168_v27  ;;  %v2039_v22 = vand.u32 4294901760, %v625_v18 }
  0x42   :  { %1541 = vmatprep.subr.mxu0 %v1907_v23  ;;  %1546 = vmatprep.subr.mxu1 %v1880_v3  ;;  %v790_v31 = vand.u32 4294901760, %v789_v25 }
  0x43   :  { %1542 = vmatpush3.msra.mxu0 %v1907_v23  ;;  %1543 = vmatprep.mubr.f32.mxu0 %v1890_v13  ;;  %v2051_v27 = vsub.f32 %v625_v18, %v2039_v22 }
  0x44   :  { %1547 = vmatpush3.msra.mxu1 %v1880_v3  ;;  %1544 = vmatmul.mubr.f32.vlgmr.msra.gmra.mxu0 %v1892_v14  ;;  %v2001_v3 = vand.u32 4294901760, %v1992_v62 }
  0x45   :  { %1548 = vmatprep.subr.mxu1 %v1882_v4  ;;  %1554 = vmatprep.mubr.f32.mxu1 %v1890_v13  ;;  %v2060_v33 = vand.u32 4294901760, %v2051_v27 }
  0x46   :  { %1549 = vmatpush3.msra.mxu1 %v1882_v4  ;;  %1557 = vmatprep.subr.mxu0 %v1919_v40  ;;  %v2004_v4 = vsub.f32 %v629_v59, %v1994_v63  ;;  %v768_v8 = vsub.f32 %v1992_v62, %v2001_v3  ;;  %v2090_v59 = vand.u32 4294901760, %v2078_v47 }
  0x47   :  { %1550 = vmatprep.subr.mxu1 %v1884_v5  ;;  %1558 = vmatpush3.msra.mxu0 %v1919_v40  ;;  %2319 = vst [vmem:[#allocation11_spill] sm:$0xff] %v2060_v33  ;;  %v803_v38 = vsub.f32 %v2051_v27, %v2060_v33 }
  0x48   :  { %1551 = vmatpush3.msra.mxu1 %v1884_v5  ;;  %1559 = vmatprep.subr.mxu0 %v1923_v41  ;;  %v2007_v5 = vand.u32 4294901760, %v628_v0  ;;  %v769_v13 = vand.u32 4294901760, %v768_v8  ;;  %2321 = vst [vmem:[#allocation13_spill] sm:$0xff] %v2090_v59  ;;  %v619_v8 = vld [vmem:[#allocation7] sm:$0xff] }
  0x49   :  { %1552 = vmatprep.subr.mxu1 %v1886_v9  ;;  %1560 = vmatpush3.msra.mxu0 %v1923_v41  ;;  %v2113_v18 = vand.u32 4294901760, %v619_v8 }
  0x4a   :  { %1553 = vmatpush3.msra.mxu1 %v1886_v9  ;;  %1561 = vmatprep.subr.mxu0 %v1967_v51  ;;  %v2013_v9 = vand.u32 4294901760, %v2004_v4  ;;  %v2018_v11 = vsub.f32 %v628_v0, %v2007_v5  ;;  %v811_v0 = vand.u32 4294901760, %v810_v50 }
  0x4b   :  { %1555 = vmatmul.mubr.f32.vlgmr.msra.gmra.mxu1 %v1892_v14  ;;  %1592 = vmatprep.subr.mxu1 %v741_v48 }
  0x4c   :  { %1593 = vmatpush3.msra.mxu1 %v741_v48  ;;  %1562 = vmatpush3.msra.mxu0 %v1967_v51  ;;  %v775_v14 = vsub.f32 %v2004_v4, %v2013_v9  ;;  %v2030_v17 = vand.u32 4294901760, %v2018_v11  ;;  %v621_v48 = vld [vmem:[#allocation7 + $0x10] sm:$0xff] }
  0x4d   :  { %1594 = vmatprep.subr.mxu1 %v748_v49  ;;  %1563 = vmatprep.subr.mxu0 %v1972_v54  ;;  %v2086_v55 = vand.u32 4294901760, %v621_v48 }
  0x4e   :  { %1595 = vmatpush3.msra.mxu1 %v748_v49  ;;  %1564 = vmatpush3.msra.mxu0 %v1972_v54  ;;  %v776_v19 = vand.u32 4294901760, %v775_v14  ;;  %v782_v23 = vsub.f32 %v2018_v11, %v2030_v17  ;;  %v804_v49 = vand.u32 4294901760, %v803_v38  ;;  %v2111_v14 = vsub.f32 %v620_v60, %v2099_v6 }
  0x4f   :  { %1565 = vmatprep.subr.mxu0 %v1982_v58  ;;  %1596 = vmatprep.subr.mxu1 %v755_v1  ;;  %v2097_v2 = vsub.f32 %v621_v48, %v2086_v55 }
  0x50   :  { %1566 = vmatpush3.msra.mxu0 %v1982_v58  ;;  %1597 = vmatpush3.msra.mxu1 %v755_v1  ;;  %v783_v29 = vand.u32 4294901760, %v782_v23  ;;  %v2094_v1 = vand.u32 4294901760, %v2084_v52  ;;  %v2120_v25 = vand.u32 4294901760, %v2111_v14 }
  0x51   :  { %1567 = vmatprep.subr.mxu0 %v1994_v63  ;;  %1598 = vmatprep.subr.mxu1 %v762_v7 }
  0x52   :  { %1568 = vmatpush3.msra.mxu0 %v1994_v63  ;;  %1599 = vmatpush3.msra.mxu1 %v762_v7  ;;  %2322 = vst [vmem:[#allocation14_spill] sm:$0xff] %v2094_v1  ;;  %v817_v7 = vsub.f32 %v2078_v47, %v2090_v59  ;;  %v824_v12 = vsub.f32 %v2084_v52, %v2094_v1  ;;  %2324 = vst [vmem:[#allocation16_spill] sm:$0xff] %v2120_v25 }
  0x53   :  { %1569 = vmatprep.subr.mxu0 %v2007_v5  ;;  %1600 = vmatprep.subr.mxu1 %v769_v13 }
  0x54   :  { %1570 = vmatpush3.msra.mxu0 %v2007_v5  ;;  %1601 = vmatpush3.msra.mxu1 %v769_v13  ;;  %v2108_v13 = vand.u32 4294901760, %v2097_v2  ;;  %v825_v23 = vand.u32 4294901760, %v824_v12 }
  0x55   :  { %1571 = vmatprep.subr.mxu0 %v2015_v10  ;;  %1602 = vmatprep.subr.mxu1 %v776_v19 }
  0x56   :  { %1572 = vmatpush3.msra.mxu0 %v2015_v10  ;;  %1603 = vmatpush3.msra.mxu1 %v776_v19  ;;  %2323 = vst [vmem:[#allocation15_spill] sm:$0xff] %v2108_v13  ;;  %v818_v19 = vand.u32 4294901760, %v817_v7  ;;  %v831_v24 = vsub.f32 %v2097_v2, %v2108_v13 }
  0x57   :  { %1573 = vmatprep.subr.mxu0 %v2026_v16  ;;  %1604 = vmatprep.subr.mxu1 %v783_v29 }
  0x58   :  { %1574 = vmatpush3.msra.mxu0 %v2026_v16  ;;  %1605 = vmatpush3.msra.mxu1 %v783_v29  ;;  %v2123_v29 = vsub.f32 %v619_v8, %v2113_v18  ;;  %v832_v30 = vand.u32 4294901760, %v831_v24 }
  0x59   :  { %1575 = vmatprep.subr.mxu0 %v2039_v22  ;;  %1606 = vmatprep.subr.mxu1 %v790_v31 }
  0x5a   :  { %1576 = vmatpush3.msra.mxu0 %v2039_v22  ;;  %1607 = vmatpush3.msra.mxu1 %v790_v31  ;;  %v838_v31 = vsub.f32 %v2111_v14, %v2120_v25  ;;  %v2130_v32 = vand.u32 4294901760, %v2123_v29 }
  0x5b   :  { %1577 = vmatprep.subr.mxu0 %v2053_v28  ;;  %1608 = vmatprep.subr.mxu1 %v797_v37 }
  0x5c   :  { %1578 = vmatpush3.msra.mxu0 %v2053_v28  ;;  %1609 = vmatpush3.msra.mxu1 %v797_v37  ;;  %2325 = vst [vmem:[#allocation17_spill] sm:$0xff] %v2130_v32  ;;  %v839_v36 = vand.u32 4294901760, %v838_v31  ;;  %v845_v37 = vsub.f32 %v2123_v29, %v2130_v32 }
  0x5d   :  { %1579 = vmatprep.subr.mxu0 %v2066_v35  ;;  %1610 = vmatprep.subr.mxu1 %v804_v49 }
  0x5e   :  { %1580 = vmatpush3.msra.mxu0 %v2066_v35  ;;  %1611 = vmatpush3.msra.mxu1 %v804_v49  ;;  %v846_v38 = vand.u32 4294901760, %v845_v37  ;;  %v1345_v49 = vld [vmem:[%s2298_s2] ss:$0 sm:$0xff] }
  0x5f   :  { %1581 = vmatprep.subr.mxu0 %v2074_v46  ;;  %1612 = vmatprep.subr.mxu1 %v811_v0 }
  0x60   :  { %1582 = vmatpush3.msra.mxu0 %v2074_v46  ;;  %1613 = vmatpush3.msra.mxu1 %v811_v0 }
  0x61   :  { %1583 = vmatprep.subr.mxu0 %v2086_v55  ;;  %1614 = vmatprep.subr.mxu1 %v818_v19 }
  0x62   :  { %1584 = vmatpush3.msra.mxu0 %v2086_v55  ;;  %1615 = vmatpush3.msra.mxu1 %v818_v19 }
  0x63   :  { %1585 = vmatprep.subr.mxu0 %v2099_v6  ;;  %1616 = vmatprep.subr.mxu1 %v825_v23 }
  0x64   :  { %1586 = vmatpush3.msra.mxu0 %v2099_v6  ;;  %1617 = vmatpush3.msra.mxu1 %v825_v23 }
  0x65   :  { %1587 = vmatprep.subr.mxu0 %v2113_v18  ;;  %1618 = vmatprep.subr.mxu1 %v832_v30 }
  0x66   :  { %1588 = vmatpush3.msra.mxu0 %v2113_v18  ;;  %1619 = vmatpush3.msra.mxu1 %v832_v30 }
  0x67   :  { %1627 = vmatprep.subr.mxu0 %v1929_v42  ;;  %1620 = vmatprep.subr.mxu1 %v839_v36 }
  0x68   :  { %1621 = vmatpush3.msra.mxu1 %v839_v36 }
  0x69   :  { %1622 = vmatprep.subr.mxu1 %v846_v38 }
  0x6a   :  { %1623 = vmatpush3.msra.mxu1 %v846_v38 }
  0x6b   :  { %1662 = vmatprep.subr.mxu1 %v1919_v40 }
  0xf2   :  { %v1501_v48 = vpop.f32.mrf.mxu0 }
  0xf3   :  { %v173_v0 = vadd.f32 %v1501_v48, %v1345_v49 }
  0xf4   :  { %v162_v50 = vpop.f32.mrf.mxu0 }
  0xf5   :  { %v163_v7 = vadd.f32 %v1345_v49, %v162_v50 }
  0xf7   :  { %v1512_v60 = vpop.f32.mrf.mxu1 }
  0xf8   :  { %v270_v19 = vadd.f32 %v1512_v60, %v173_v0 }
  0xf9   :  { %v263_v8 = vpop.f32.mrf.mxu1 }
  0xfa   :  { %v1523_v12 = vpop.f32.mrf.mxu0  ;;  %v264_v24 = vadd.f32 %v263_v8, %v163_v7 }
  0xfb   :  { %v357_v31 = vadd.f32 %v1523_v12, %v270_v19 }
  0xfc   :  { %v349_v30 = vpop.f32.mrf.mxu0 }
  0xfd   :  { %v350_v38 = vadd.f32 %v349_v30, %v264_v24 }
 0x101   :  { %v1534_v23 = vpop.f32.mrf.mxu1 }
 0x102   :  { %v442_v32 = vadd.f32 %v1534_v23, %v357_v31 }
 0x103   :  { %v433_v36 = vpop.f32.mrf.mxu1 }
 0x104   :  { %v1545_v37 = vpop.f32.mrf.mxu0  ;;  %v434_v25 = vadd.f32 %v433_v36, %v350_v38 }
 0x105   :  { %v531_v1 = vadd.f32 %v1545_v37, %v442_v32 }
 0x106   :  { %v524_v13 = vpop.f32.mrf.mxu0 }
 0x107   :  { %v525_v39 = vadd.f32 %v524_v13, %v434_v25 }
 0x10b   :  { %v1556_v59 = vpop.f32.mrf.mxu1 }
 0x10c   :  { %v612_v33 = vadd.f32 %v1556_v59, %v531_v1 }
 0x10d   :  { %v605_v26 = vpop.f32.mrf.mxu1 }
 0x10e   :  { %v616_v48 = vmax.f32 %v612_v33, 0.0  ;;  %v606_v49 = vadd.f32 %v605_v26, %v525_v39 }
 0x110   :  { %v2140_v50 = vand.u32 4294901760, %v616_v48  ;;  %v615_v60 = vmax.f32 %v606_v49, 0.0 }
 0x112   :  { %v2143_v0 = vsub.f32 %v616_v48, %v2140_v50  ;;  %v2145_v7 = vand.u32 4294901760, %v615_v60 }
 0x114   :  { %v728_v8 = vand.u32 4294901760, %v2143_v0  ;;  %v717_v12 = vsub.f32 %v615_v60, %v2145_v7  ;;  %1624 = vmatprep.mubr.f32.mxu1 %v2145_v7 }
 0x115   :  { %1625 = vmatmul.mubr.f32.vlgmr.msra.gmra.mxu1 %v2140_v50 }
 0x116   :  { %1663 = vmatpush3.msra.mxu1 %v1919_v40  ;;  %v718_v33 = vand.u32 4294901760, %v717_v12  ;;  %v729_v26 = vsub.f32 %v2143_v0, %v728_v8 }
 0x117   :  { %1664 = vmatprep.subr.mxu1 %v1923_v41 }
 0x118   :  { %1665 = vmatpush3.msra.mxu1 %v1923_v41  ;;  %1694 = vmatprep.mubr.f32.mxu1 %v718_v33  ;;  %v719_v39 = vsub.f32 %v717_v12, %v718_v33  ;;  %v730_v1 = vand.u32 4294901760, %v729_v26 }
 0x119   :  { %1666 = vmatprep.subr.mxu1 %v1967_v51 }
 0x11a   :  { %1667 = vmatpush3.msra.mxu1 %v1967_v51  ;;  %v720_v59 = vand.u32 4294901760, %v719_v39 }
 0x11b   :  { %1668 = vmatprep.subr.mxu1 %v1972_v54 }
 0x11c   :  { %1669 = vmatpush3.msra.mxu1 %v1972_v54  ;;  %1589 = vmatprep.mubr.f32.mxu0 %v720_v59 }
 0x11d   :  { %1670 = vmatprep.subr.mxu1 %v1982_v58  ;;  %1590 = vmatmul.mubr.f32.vlgmr.msra.gmra.mxu0 %v730_v1 }
 0x11e   :  { %1628 = vmatpush3.msra.mxu0 %v1929_v42  ;;  %1671 = vmatpush3.msra.mxu1 %v1982_v58  ;;  %v2328_v42 = vld [vmem:[#allocation12_spill] sm:$0xff] }
 0x11f   :  { %1629 = vmatprep.subr.mxu0 %v1934_v43  ;;  %1659 = vmatprep.mubr.f32.mxu0 %v717_v12 }
 0x120   :  { %1672 = vmatprep.subr.mxu1 %v1994_v63  ;;  %1630 = vmatpush3.msra.mxu0 %v1934_v43  ;;  %v2329_v43 = vld [vmem:[#allocation13_spill] sm:$0xff] }
 0x121   :  { %1673 = vmatpush3.msra.mxu1 %v1994_v63  ;;  %1631 = vmatprep.subr.mxu0 %v1970_v53 }
 0x122   :  { %1674 = vmatprep.subr.mxu1 %v2007_v5  ;;  %1632 = vmatpush3.msra.mxu0 %v1970_v53  ;;  %v2333_v53 = vld [vmem:[#allocation17_spill] sm:$0xff] }
 0x123   :  { %1675 = vmatpush3.msra.mxu1 %v2007_v5  ;;  %1633 = vmatprep.subr.mxu0 %v1980_v57 }
 0x124   :  { %1676 = vmatprep.subr.mxu1 %v2015_v10  ;;  %1634 = vmatpush3.msra.mxu0 %v1980_v57 }
 0x125   :  { %1677 = vmatpush3.msra.mxu1 %v2015_v10  ;;  %1635 = vmatprep.subr.mxu0 %v1992_v62 }
 0x126   :  { %1678 = vmatprep.subr.mxu1 %v2026_v16  ;;  %1636 = vmatpush3.msra.mxu0 %v1992_v62 }
 0x127   :  { %1679 = vmatpush3.msra.mxu1 %v2026_v16  ;;  %1637 = vmatprep.subr.mxu0 %v2004_v4 }
 0x128   :  { %1680 = vmatprep.subr.mxu1 %v2039_v22  ;;  %1638 = vmatpush3.msra.mxu0 %v2004_v4 }
 0x129   :  { %1681 = vmatpush3.msra.mxu1 %v2039_v22  ;;  %1639 = vmatprep.subr.mxu0 %v2018_v11 }
 0x12a   :  { %1682 = vmatprep.subr.mxu1 %v2053_v28  ;;  %1640 = vmatpush3.msra.mxu0 %v2018_v11 }
 0x12b   :  { %1683 = vmatpush3.msra.mxu1 %v2053_v28  ;;  %1641 = vmatprep.subr.mxu0 %v2024_v15 }
 0x12c   :  { %1684 = vmatprep.subr.mxu1 %v2066_v35  ;;  %1642 = vmatpush3.msra.mxu0 %v2024_v15 }
 0x12d   :  { %1685 = vmatpush3.msra.mxu1 %v2066_v35  ;;  %1643 = vmatprep.subr.mxu0 %v2037_v21 }
 0x12e   :  { %1686 = vmatprep.subr.mxu1 %v2074_v46  ;;  %1644 = vmatpush3.msra.mxu0 %v2037_v21  ;;  %v1346_v21 = vld [vmem:[%s2300_s4] ss:$0 sm:$0xff] }
 0x12f   :  { %1687 = vmatpush3.msra.mxu1 %v2074_v46  ;;  %1645 = vmatprep.subr.mxu0 %v2051_v27 }
 0x130   :  { %1688 = vmatprep.subr.mxu1 %v2086_v55  ;;  %1646 = vmatpush3.msra.mxu0 %v2051_v27 }
 0x131   :  { %1689 = vmatpush3.msra.mxu1 %v2086_v55  ;;  %1647 = vmatprep.subr.mxu0 %v2063_v34 }
 0x132   :  { %1690 = vmatprep.subr.mxu1 %v2099_v6  ;;  %1648 = vmatpush3.msra.mxu0 %v2063_v34 }
 0x133   :  { %1691 = vmatpush3.msra.mxu1 %v2099_v6  ;;  %1649 = vmatprep.subr.mxu0 %v2078_v47 }
 0x134   :  { %1692 = vmatprep.subr.mxu1 %v2113_v18  ;;  %1650 = vmatpush3.msra.mxu0 %v2078_v47 }
 0x135   :  { %1693 = vmatpush3.msra.mxu1 %v2113_v18  ;;  %1651 = vmatprep.subr.mxu0 %v2084_v52 }
 0x136   :  { %1695 = vmatmul.mubr.f32.vlgmr.msra.gmra.mxu1 %v728_v8  ;;  %1732 = vmatprep.subr.mxu1 %v1919_v40 }
 0x137   :  { %1652 = vmatpush3.msra.mxu0 %v2084_v52  ;;  %1733 = vmatpush3.msra.mxu1 %v1919_v40  ;;  %v2326_v40 = vld [vmem:[#allocation10_spill] sm:$0xff] }
 0x138   :  { %1764 = vmatprep.mubr.f32.mxu1 %v2145_v7  ;;  %1653 = vmatprep.subr.mxu0 %v2097_v2 }
 0x139   :  { %1734 = vmatprep.subr.mxu1 %v1923_v41  ;;  %1654 = vmatpush3.msra.mxu0 %v2097_v2 }
 0x13a   :  { %1735 = vmatpush3.msra.mxu1 %v1923_v41  ;;  %1655 = vmatprep.subr.mxu0 %v2111_v14  ;;  %v2327_v41 = vld [vmem:[#allocation11_spill] sm:$0xff] }
 0x13b   :  { %1736 = vmatprep.subr.mxu1 %v1967_v51  ;;  %1656 = vmatpush3.msra.mxu0 %v2111_v14 }
 0x13c   :  { %1737 = vmatpush3.msra.mxu1 %v1967_v51  ;;  %1657 = vmatprep.subr.mxu0 %v2123_v29  ;;  %v2332_v51 = vld [vmem:[#allocation16_spill] sm:$0xff] }
 0x13d   :  { %1738 = vmatprep.subr.mxu1 %v1972_v54  ;;  %1658 = vmatpush3.msra.mxu0 %v2123_v29 }
 0x13e   :  { %1739 = vmatpush3.msra.mxu1 %v1972_v54  ;;  %1660 = vmatmul.mubr.f32.vlgmr.msra.gmra.mxu0 %v2143_v0 }
 0x13f   :  { %1697 = vmatprep.subr.mxu0 %v1939_v44  ;;  %1740 = vmatprep.subr.mxu1 %v1982_v58 }
 0x140   :  { %1698 = vmatpush3.msra.mxu0 %v1939_v44  ;;  %1729 = vmatprep.mubr.f32.mxu0 %v2145_v7  ;;  %v2330_v44 = vld [vmem:[#allocation14_spill] sm:$0xff] }
 0x141   :  { %1741 = vmatpush3.msra.mxu1 %v1982_v58  ;;  %1699 = vmatprep.subr.mxu0 %v1943_v45 }
 0x142   :  { %1742 = vmatprep.subr.mxu1 %v1994_v63  ;;  %1700 = vmatpush3.msra.mxu0 %v1943_v45  ;;  %v2331_v45 = vld [vmem:[#allocation15_spill] sm:$0xff] }
 0x143   :  { %1743 = vmatpush3.msra.mxu1 %v1994_v63  ;;  %1701 = vmatprep.subr.mxu0 %v1977_v56 }
 0x144   :  { %1744 = vmatprep.subr.mxu1 %v2007_v5  ;;  %1702 = vmatpush3.msra.mxu0 %v1977_v56 }
 0x145   :  { %1745 = vmatpush3.msra.mxu1 %v2007_v5  ;;  %1703 = vmatprep.subr.mxu0 %v1989_v61 }
 0x146   :  { %1746 = vmatprep.subr.mxu1 %v2015_v10  ;;  %1704 = vmatpush3.msra.mxu0 %v1989_v61 }
 0x147   :  { %1747 = vmatpush3.msra.mxu1 %v2015_v10  ;;  %1705 = vmatprep.subr.mxu0 %v2001_v3 }
 0x148   :  { %1748 = vmatprep.subr.mxu1 %v2026_v16  ;;  %1706 = vmatpush3.msra.mxu0 %v2001_v3 }
 0x149   :  { %1749 = vmatpush3.msra.mxu1 %v2026_v16  ;;  %1707 = vmatprep.subr.mxu0 %v2013_v9 }
 0x14a   :  { %1750 = vmatprep.subr.mxu1 %v2039_v22  ;;  %1708 = vmatpush3.msra.mxu0 %v2013_v9 }
 0x14b   :  { %1751 = vmatpush3.msra.mxu1 %v2039_v22  ;;  %1709 = vmatprep.subr.mxu0 %v2030_v17 }
 0x14c   :  { %1752 = vmatprep.subr.mxu1 %v2053_v28  ;;  %1710 = vmatpush3.msra.mxu0 %v2030_v17 }
 0x14d   :  { %1753 = vmatpush3.msra.mxu1 %v2053_v28  ;;  %1711 = vmatprep.subr.mxu0 %v2034_v20 }
 0x14e   :  { %1754 = vmatprep.subr.mxu1 %v2066_v35  ;;  %1712 = vmatpush3.msra.mxu0 %v2034_v20 }
 0x14f   :  { %1755 = vmatpush3.msra.mxu1 %v2066_v35  ;;  %1713 = vmatprep.subr.mxu0 %v2326_v40 }
 0x150   :  { %1756 = vmatprep.subr.mxu1 %v2074_v46  ;;  %1714 = vmatpush3.msra.mxu0 %v2326_v40 }
 0x151   :  { %1757 = vmatpush3.msra.mxu1 %v2074_v46  ;;  %1715 = vmatprep.subr.mxu0 %v2327_v41 }
 0x152   :  { %1758 = vmatprep.subr.mxu1 %v2086_v55  ;;  %1716 = vmatpush3.msra.mxu0 %v2327_v41 }
 0x153   :  { %1759 = vmatpush3.msra.mxu1 %v2086_v55  ;;  %1717 = vmatprep.subr.mxu0 %v2328_v42 }
 0x154   :  { %1760 = vmatprep.subr.mxu1 %v2099_v6  ;;  %1718 = vmatpush3.msra.mxu0 %v2328_v42 }
 0x155   :  { %1761 = vmatpush3.msra.mxu1 %v2099_v6  ;;  %1719 = vmatprep.subr.mxu0 %v2329_v43 }
 0x156   :  { %1762 = vmatprep.subr.mxu1 %v2113_v18  ;;  %1720 = vmatpush3.msra.mxu0 %v2329_v43 }
 0x157   :  { %1763 = vmatpush3.msra.mxu1 %v2113_v18  ;;  %1721 = vmatprep.subr.mxu0 %v2330_v44 }
 0x158   :  { %1765 = vmatmul.mubr.f32.vlgmr.msra.gmra.mxu1 %v2140_v50  ;;  %1722 = vmatpush3.msra.mxu0 %v2330_v44 }
 0x159   :  { %1723 = vmatprep.subr.mxu0 %v2331_v45 }
 0x15a   :  { %1724 = vmatpush3.msra.mxu0 %v2331_v45 }
 0x15b   :  { %1725 = vmatprep.subr.mxu0 %v2332_v51 }
 0x15c   :  { %1726 = vmatpush3.msra.mxu0 %v2332_v51 }
 0x15d   :  { %1727 = vmatprep.subr.mxu0 %v2333_v53 }
 0x15e   :  { %1728 = vmatpush3.msra.mxu0 %v2333_v53 }
 0x15f   :  { %1730 = vmatmul.mubr.f32.vlgmr.msra.gmra.mxu0 %v2140_v50 }
 0x1d5   :  { %v1626_v56 = vpop.f32.mrf.mxu1 }
 0x1d7   :  { %v883_v61 = vpop.f32.mrf.mxu1 }
 0x1dd   :  { %v1591_v54 = vpop.f32.mrf.mxu0 }
 0x1de   :  { %v890_v62 = vadd.f32 %v1626_v56, %v1591_v54 }
 0x1df   :  { %v722_v57 = vpop.f32.mrf.mxu0 }
 0x1e0   :  { %v884_v4 = vadd.f32 %v883_v61, %v722_v57 }
 0x1f6   :  { %v1696_v63 = vpop.f32.mrf.mxu1 }
 0x1f8   :  { %v1089_v10 = vpop.f32.mrf.mxu1 }
 0x1fe   :  { %v1661_v58 = vpop.f32.mrf.mxu0 }
 0x1ff   :  { %v1001_v5 = vadd.f32 %v1661_v58, %v890_v62 }
 0x200   :  { %v993_v3 = vpop.f32.mrf.mxu0 }
 0x201   :  { %v994_v9 = vadd.f32 %v993_v3, %v884_v4  ;;  %v1098_v11 = vadd.f32 %v1696_v63, %v1001_v5 }
 0x203   :  { %v1090_v20 = vadd.f32 %v1089_v10, %v994_v9 }
 0x218   :  { %v1766_v15 = vpop.f32.mrf.mxu1 }
 0x21a   :  { %v1309_v34 = vpop.f32.mrf.mxu1 }
 0x21f   :  { %v1731_v16 = vpop.f32.mrf.mxu0 }
 0x220   :  { %v1223_v17 = vadd.f32 %v1731_v16, %v1098_v11 }
 0x221   :  { %v1216_v22 = vpop.f32.mrf.mxu0 }
 0x222   :  { %v1316_v27 = vadd.f32 %v1766_v15, %v1223_v17  ;;  %v1217_v28 = vadd.f32 %v1216_v22, %v1090_v20 }
 0x224   :  { %v1336_v35 = vadd.f32 %v1346_v21, %v1316_v27  ;;  %v1310_v46 = vadd.f32 %v1309_v34, %v1217_v28 }
 0x226   :  { %1338 = vst [vmem:[%s2301_s5 + $0x8] sm:$0xff] %v1336_v35  ;;  %v1335_v47 = vadd.f32 %v1346_v21, %v1310_v46 }
 0x228   :  { %1337 = vst [vmem:[%s2301_s5] sm:$0xff] %v1335_v47 }
 0x229   :  { %1343 = vsyncpa [#allocation4], 1 }
 0x22a   :  { %1344 = vsyncpa [#allocation6], 1 }

</bundles_post_ra>
